<compile_context>
chip_gen: v6e
topology: v6e:2x2x1
jax: 0.10.0
libtpu: 0.0.40
codegen_flags: <defaults>
</compile_context>

<pallas_src>
import functools

import jax
import jax.numpy as jnp
import numpy as np
from jax.experimental import pallas as pl
from jax.experimental.pallas import tpu as pltpu

BN_EPS = 1e-5


def _ghost_bn_kernel(x_ref, gamma_ref, beta_ref, o_ref, *, inv_count, eps):
    # x_ref / o_ref: (g_tile, vbs, ct, H*W) in the input dtype.
    # gamma_ref / beta_ref: (1, 1, ct, 1) f32.
    xf = x_ref[...].astype(jnp.float32)  # upcast once; all stats in f32

    # Single-pass per-(ghost-batch, channel) statistics over (vbs, H, W):
    # lane-axis reduction first (XLU), then the small virtual-batch axis (VPU).
    s = jnp.sum(xf, axis=3, keepdims=True)                    # (gt, vbs, ct, 1)
    ss = jnp.sum(xf * xf, axis=3, keepdims=True)              # (gt, vbs, ct, 1)
    mean = jnp.sum(s, axis=1, keepdims=True) * inv_count      # (gt, 1,  ct, 1)
    ex2 = jnp.sum(ss, axis=1, keepdims=True) * inv_count
    # biased variance (matches torch training-mode forward); clamp guards the
    # E[x^2] - E[x]^2 cancellation when |mean| >> std.
    var = jnp.maximum(ex2 - mean * mean, 0.0)

    inv_std = jax.lax.rsqrt(var + eps)                        # EUP slot
    scale = gamma_ref[...] * inv_std                          # (gt, 1, ct, 1)
    shift = beta_ref[...] - mean * scale
    o_ref[...] = (xf * scale + shift).astype(o_ref.dtype)


def _vmem_budget_bytes():
    """(physical VMEM bytes, per-step block budget in bytes)."""
    try:
        phys = int(pltpu.get_tpu_info().vmem_capacity_bytes)
    except Exception:  # be conservative if the query is unavailable
        phys = 64 * 1024 * 1024
    if phys <= 64 * 1024 * 1024:
        budget = 48 * 1024 * 1024   # v7x-class: leave ~16 MiB headroom
    else:
        budget = 100 * 1024 * 1024  # v5e/v6e: 128 MiB physical
    return phys, budget


def _divisors_desc(n):
    return [d for d in range(n, 0, -1) if n % d == 0]


def _pick_tiles(G, C, vbs, HW, itemsize, budget):
    """Choose (g_tile, c_tile) so one grid step (2x in + 2x out double-buffers
    at the native dtype plus ~3 block-sized f32 temporaries) fits `budget`."""
    per_elem = 4 * itemsize + 12  # estimated VMEM bytes per block element

    def bytes_for(gt_, ct_):
        return gt_ * vbs * ct_ * HW * per_elem

    # sublane multiple for the block's second-minor dim: 8 for f32, 16 for bf16
    pack = 8 * max(1, 4 // itemsize)
    ct = C  # full channel extent is always layout-legal (and C == vbs is small)
    if bytes_for(1, ct) > budget:
        for d in _divisors_desc(C):
            if d % pack == 0 and bytes_for(1, d) <= budget:
                ct = d
                break
        # else keep ct = C; the scoped VMEM limit is raised to cover it.

    gt = 1
    for d in _divisors_desc(G):
        if bytes_for(d, ct) <= budget:
            gt = d
            break

    # v7x has 2 TensorCores: keep >= 2 parallel grid steps when there is more
    # than one ghost batch (costs only ~0.35us/step on single-TC parts).
    if (C // ct) * (G // gt) < 2 and G >= 2:
        gt = next(d for d in _divisors_desc(G) if d <= G // 2)

    return gt, ct


def ghost_batch_norm2d(x_nchw, gamma, beta, *, vbs=16, eps=BN_EPS):
    N, C, H, W = x_nchw.shape
    assert N % vbs == 0, "torch.chunk-style uneven ghost batches not supported"
    assert gamma.shape == (C,) and beta.shape == (C,)

    G = N // vbs
    HW = H * W
    dtype = x_nchw.dtype
    itemsize = jnp.dtype(dtype).itemsize

    phys, budget = _vmem_budget_bytes()
    gt, ct = _pick_tiles(G, C, vbs, HW, itemsize, budget)

    # channel axis slow, ghost-batch axis fast -> gamma/beta DMAs are only
    # re-issued when the channel tile changes.
    grid = (C // ct, G // gt)

    x_r = x_nchw.reshape(G, vbs, C, HW)                      # pure contiguous reshape
    gamma_r = gamma.reshape(1, 1, C, 1).astype(jnp.float32)  # tiny, f32 for the math
    beta_r = beta.reshape(1, 1, C, 1).astype(jnp.float32)

    kernel = functools.partial(
        _ghost_bn_kernel, inv_count=1.0 / float(vbs * HW), eps=float(eps))

    est = gt * vbs * ct * HW * (4 * itemsize + 12)
    vmem_limit = int(min(max(budget, est), phys - 8 * 1024 * 1024))

    out = pl.pallas_call(
        kernel,
        out_shape=jax.ShapeDtypeStruct((G, vbs, C, HW), dtype),
        grid_spec=pltpu.PrefetchScalarGridSpec(
            num_scalar_prefetch=0,
            grid=grid,
            in_specs=[
                pl.BlockSpec((gt, vbs, ct, HW), lambda c, g: (g, 0, c, 0)),
                pl.BlockSpec((1, 1, ct, 1), lambda c, g: (0, 0, c, 0)),
                pl.BlockSpec((1, 1, ct, 1), lambda c, g: (0, 0, c, 0)),
            ],
            out_specs=pl.BlockSpec((gt, vbs, ct, HW), lambda c, g: (g, 0, c, 0)),
        ),
        compiler_params=pltpu.CompilerParams(
            dimension_semantics=("parallel", "parallel"),
            vmem_limit_bytes=vmem_limit,
        ),
    )(x_r, gamma_r, beta_r)

    return out.reshape(N, C, H, W)


def ghost_batch_norm2d_reference(x_nchw, gamma, beta, *, vbs=16, eps=BN_EPS):
    # pure-JAX two-pass reference matching the PyTorch module in training mode
    # (per-virtual-batch biased statistics, shared affine).
    N, C, H, W = x_nchw.shape
    G = N // vbs
    xr = x_nchw.astype(jnp.float32).reshape(G, vbs, C, H, W)
    mean = xr.mean(axis=(1, 3, 4), keepdims=True)
    var = ((xr - mean) ** 2).mean(axis=(1, 3, 4), keepdims=True)
    g = gamma.reshape(1, 1, C, 1, 1).astype(jnp.float32)
    b = beta.reshape(1, 1, C, 1, 1).astype(jnp.float32)
    y = (xr - mean) / jnp.sqrt(var + eps) * g + b
    return y.reshape(N, C, H, W)


if __name__ == "__main__":
    key = jax.random.PRNGKey(0)
    kx, kg, kb = jax.random.split(key, 3)

    vbs = 16
    # nn.BatchNorm2d(vbs) => channel count must equal vbs; two ghost batches.
    N, C, H, W = 2 * vbs, vbs, 16, 16
    x = jax.random.normal(kx, (N, C, H, W), jnp.float32)
    gamma = 1.0 + 0.1 * jax.random.normal(kg, (C,), jnp.float32)
    beta = 0.1 * jax.random.normal(kb, (C,), jnp.float32)

    # f32 path
    out = jax.block_until_ready(ghost_batch_norm2d(x, gamma, beta, vbs=vbs))
    ref = jax.block_until_ready(ghost_batch_norm2d_reference(x, gamma, beta, vbs=vbs))
    assert out.shape == (N, C, H, W) and out.dtype == x.dtype
    np.testing.assert_allclose(np.asarray(out), np.asarray(ref), rtol=1e-4, atol=1e-4)

    # native-dtype (bf16) I/O path: stats still accumulate in f32 in-kernel.
    xb = x.astype(jnp.bfloat16)
    out_b = jax.block_until_ready(ghost_batch_norm2d(xb, gamma, beta, vbs=vbs))
    ref_b = ghost_batch_norm2d_reference(xb.astype(jnp.float32), gamma, beta, vbs=vbs)
    assert out_b.shape == (N, C, H, W) and out_b.dtype == jnp.bfloat16
    np.testing.assert_allclose(
        np.asarray(out_b, dtype=np.float32), np.asarray(ref_b), rtol=5e-2, atol=5e-2)

    print("KERNEL_OK")
</pallas_src>

<mosaic_0001>
module attributes {stable_mosaic.version = 11 : i64} {
  func.func @_ghost_bn_kernel(%arg0: i32, %arg1: i32, %arg2: memref<1x16x16x256xf32, #tpu.memory_space<vmem>>, %arg3: memref<1x1x16x1xf32, #tpu.memory_space<vmem>>, %arg4: memref<1x1x16x1xf32, #tpu.memory_space<vmem>>, %arg5: memref<1x16x16x256xf32, #tpu.memory_space<vmem>>) attributes {dimension_semantics = [#tpu.dimension_semantics<parallel>, #tpu.dimension_semantics<parallel>], iteration_bounds = array<i64: 1, 2>, scalar_prefetch = 0 : i64, scratch_operands = 0 : i64, tpu.core_type = #tpu.core_type<tc>, window_params = [{transform_indices = @transform_0, window_bounds = array<i64: 1, 16, 16, 256>}, {transform_indices = @transform_1, window_bounds = array<i64: 1, 1, 16, 1>}, {transform_indices = @transform_2, window_bounds = array<i64: 1, 1, 16, 1>}, {transform_indices = @transform_3, window_bounds = array<i64: 1, 16, 16, 256>}]} {
    %c0 = arith.constant 0 : index
    %c0_0 = arith.constant 0 : index
    %c0_1 = arith.constant 0 : index
    %c0_2 = arith.constant 0 : index
    %0 = vector.load %arg2[%c0, %c0_0, %c0_1, %c0_2] : memref<1x16x16x256xf32, #tpu.memory_space<vmem>>, vector<1x16x16x256xf32>
    %cst = arith.constant dense<0.000000e+00> : vector<1x16x16xf32>
    %1 = vector.multi_reduction <add>, %0, %cst [3] : vector<1x16x16x256xf32> to vector<1x16x16xf32>
    %2 = vector.shape_cast %1 : vector<1x16x16xf32> to vector<1x16x16x1xf32>
    %3 = arith.mulf %0, %0 : vector<1x16x16x256xf32>
    %cst_3 = arith.constant dense<0.000000e+00> : vector<1x16x16xf32>
    %4 = vector.multi_reduction <add>, %3, %cst_3 [3] : vector<1x16x16x256xf32> to vector<1x16x16xf32>
    %5 = vector.shape_cast %4 : vector<1x16x16xf32> to vector<1x16x16x1xf32>
    %cst_4 = arith.constant dense<0.000000e+00> : vector<1x16x1xf32>
    %6 = vector.multi_reduction <add>, %2, %cst_4 [1] : vector<1x16x16x1xf32> to vector<1x16x1xf32>
    %7 = vector.shape_cast %6 : vector<1x16x1xf32> to vector<1x1x16x1xf32>
    %cst_5 = arith.constant 2.44140625E-4 : f32
    %8 = vector.broadcast %cst_5 : f32 to vector<1x1x16x1xf32>
    %9 = arith.mulf %7, %8 : vector<1x1x16x1xf32>
    %cst_6 = arith.constant dense<0.000000e+00> : vector<1x16x1xf32>
    %10 = vector.multi_reduction <add>, %5, %cst_6 [1] : vector<1x16x16x1xf32> to vector<1x16x1xf32>
    %11 = vector.shape_cast %10 : vector<1x16x1xf32> to vector<1x1x16x1xf32>
    %cst_7 = arith.constant 2.44140625E-4 : f32
    %12 = vector.broadcast %cst_7 : f32 to vector<1x1x16x1xf32>
    %13 = arith.mulf %11, %12 : vector<1x1x16x1xf32>
    %14 = arith.mulf %9, %9 : vector<1x1x16x1xf32>
    %15 = arith.subf %13, %14 : vector<1x1x16x1xf32>
    %cst_8 = arith.constant 0.000000e+00 : f32
    %16 = vector.broadcast %cst_8 : f32 to vector<1x1x16x1xf32>
    %17 = arith.maximumf %15, %16 : vector<1x1x16x1xf32>
    %cst_9 = arith.constant 9.99999974E-6 : f32
    %18 = vector.broadcast %cst_9 : f32 to vector<1x1x16x1xf32>
    %19 = arith.addf %17, %18 : vector<1x1x16x1xf32>
    %20 = math.rsqrt %19 : vector<1x1x16x1xf32>
    %c0_10 = arith.constant 0 : index
    %c0_11 = arith.constant 0 : index
    %c0_12 = arith.constant 0 : index
    %c0_13 = arith.constant 0 : index
    %21 = vector.load %arg3[%c0_10, %c0_11, %c0_12, %c0_13] : memref<1x1x16x1xf32, #tpu.memory_space<vmem>>, vector<1x1x16x1xf32>
    %22 = arith.mulf %21, %20 : vector<1x1x16x1xf32>
    %c0_14 = arith.constant 0 : index
    %c0_15 = arith.constant 0 : index
    %c0_16 = arith.constant 0 : index
    %c0_17 = arith.constant 0 : index
    %23 = vector.load %arg4[%c0_14, %c0_15, %c0_16, %c0_17] : memref<1x1x16x1xf32, #tpu.memory_space<vmem>>, vector<1x1x16x1xf32>
    %24 = arith.mulf %9, %22 : vector<1x1x16x1xf32>
    %25 = arith.subf %23, %24 : vector<1x1x16x1xf32>
    %26 = vector.broadcast %22 : vector<1x1x16x1xf32> to vector<1x16x16x256xf32>
    %27 = arith.mulf %0, %26 : vector<1x16x16x256xf32>
    %28 = vector.broadcast %25 : vector<1x1x16x1xf32> to vector<1x16x16x256xf32>
    %29 = arith.addf %27, %28 : vector<1x16x16x256xf32>
    %c0_18 = arith.constant 0 : index
    %c0_19 = arith.constant 0 : index
    %c0_20 = arith.constant 0 : index
    %c0_21 = arith.constant 0 : index
    %30 = vector.load %arg5[%c0_18, %c0_19, %c0_20, %c0_21] : memref<1x16x16x256xf32, #tpu.memory_space<vmem>>, vector<1x16x16x256xf32>
    tpu.vector_store %arg5[%c0_18, %c0_19, %c0_20, %c0_21], %29 {strides = array<i32>} : memref<1x16x16x256xf32, #tpu.memory_space<vmem>>, vector<1x16x16x256xf32>,
    return
  }
  func.func @transform_0(%arg0: i32, %arg1: i32) -> (i32, i32, i32, i32) {
    %c0_i32 = arith.constant 0 : i32
    %c0_i32_0 = arith.constant 0 : i32
    %c0_i32_1 = arith.constant 0 : i32
    return %arg1, %c0_i32, %arg0, %c0_i32_0 : i32, i32, i32, i32
  }
  func.func @transform_1(%arg0: i32, %arg1: i32) -> (i32, i32, i32, i32) {
    %c0_i32 = arith.constant 0 : i32
    %c0_i32_0 = arith.constant 0 : i32
    %c0_i32_1 = arith.constant 0 : i32
    %c0_i32_2 = arith.constant 0 : i32
    return %c0_i32, %c0_i32_0, %arg0, %c0_i32_1 : i32, i32, i32, i32
  }
  func.func @transform_2(%arg0: i32, %arg1: i32) -> (i32, i32, i32, i32) {
    %c0_i32 = arith.constant 0 : i32
    %c0_i32_0 = arith.constant 0 : i32
    %c0_i32_1 = arith.constant 0 : i32
    %c0_i32_2 = arith.constant 0 : i32
    return %c0_i32, %c0_i32_0, %arg0, %c0_i32_1 : i32, i32, i32, i32
  }
  func.func @transform_3(%arg0: i32, %arg1: i32) -> (i32, i32, i32, i32) {
    %c0_i32 = arith.constant 0 : i32
    %c0_i32_0 = arith.constant 0 : i32
    %c0_i32_1 = arith.constant 0 : i32
    return %arg1, %c0_i32, %arg0, %c0_i32_0 : i32, i32, i32, i32
  }
}

</mosaic_0001>

<bundles_post_ra>
// kernel: tpu_custom_call.1
= control target key start
LH: loop header
LB: loop body
LE: loop exit
PB: predicated region body
PF: predicated region fallthrough
CT: control target
= control target key end

     0   :  { %8 = vsyncpa [#allocation3], 0  ;;  %s1992_s0 = inlined_call_operand.hbm [shape: f32[2,16,16,256], index: 0, kind: input, shape index: {}]   ;;  %s1993_s1 = inlined_call_operand.vmem [shape: f32[1,1,16,1], index: 1, kind: input, shape index: {}]   ;;  %s1994_s2 = inlined_call_operand.vmem [shape: f32[1,1,16,1], index: 2, kind: input, shape index: {}]   ;;  %s1995_s3 = inlined_call_operand.hbm [shape: f32[2,16,16,256], index: 3, kind: output, shape index: {}]  }
   0x1   :  { %10 = vsyncpa [#allocation3 + $0x1], 0 }
   0x2   :  { %11 = vsyncpa [#allocation4], 0 }
   0x3   :  { %13 = vsyncpa [#allocation4 + $0x1], 0  ;;  %s1233_s12 = smov 0   ;;  %s1235_s13 = smov 0  }
   0x4   :  { %s1237_s14 = smov 0   ;;  %s1239_s15 = smov 0  }
   0x5   :  { %s1241_s16 = smov 0   ;;  %s1243_s17 = smov 0  }
   0x6 LB: > { %s1004_s18 = sadd.s32 4294967295, %s1204_s17   ;;  %s1005_s19 = sadd.s32 4294967294, %s1204_s17   ;;  %s1204_s17 = sphi %s1243_s17, %s19_s17   ;;  %s1200_s16 = sphi %s1241_s16, %s2171_s16   ;;  %s1196_s15 = sphi %s1239_s15, %s2170_s15   ;;  %s1192_s14 = sphi %s1237_s14, %s2169_s14   ;;  %s1188_s13 = sphi %s1235_s13, %s2168_s13   ;;  %s1184_s12 = sphi %s1233_s12, %s2167_s12  }
   0x7   : > { %s28_s20 = sadd.s32 1, %s1200_s16  ;;  %s40_s21 = sadd.s32 1, %s1192_s14 }
   0x8   : > { %p29_p0 = scmp.ge.s32.totalorder %s28_s20, 2  ;;  %p47_p1 = scmp.ne.s32.totalorder %s1192_s14, %s1188_s13 }
   0x9   : > { %p48_p2 = scmp.eq.s32.totalorder %s1204_s17, 0  ;;  %p53_p3 = scmp.ne.s32.totalorder %s1188_s13, %s1184_s12 }
   0xa   : > { %s2173_s20 = smov (%p29_p0, %s28_s20), 0  ;;  %p54_p5 = scmp.eq.s32.totalorder %s1004_s18, 0 }
   0xb   : > { %p1274_p4 = por %p48_p2, %p47_p1  ;;  %s35_s23 = ssub.s32 %s1200_s16, %s2173_s20 }
   0xc   : > { %p131_p6 = scmp.eq.s32.totalorder %s1004_s18, 1  ;;  %p38_p7 = scmp.eq.s32.totalorder %s35_s23, 0 }
   0xd   : > { %p1280_p8 = por %p54_p5, %p53_p3  ;;  %p137_p10 = scmp.eq.s32.totalorder %s1005_s19, 1 }
   0xe   : > { %p1284_p9 = por %p131_p6, %p47_p1  ;;  %p1035_p13 = scmp.lt.s32.totalorder %s1204_s17, 2 }
   0xf   : > { %s1289_s26 = scalar_select %p38_p7, %s1192_s14, %s40_s21  }
  0x10   : > { %p1291_p11 = por %p137_p10, %p53_p3  ;;  %s175_s28 = sand.u32 1, %s1192_s14  }
  0x11   : > { %s1010_s29 = sshll.u32 %s175_s28, 9  ;;  %s1021_s30 = sshll.u32 %s1200_s16, 13 }
  0x12   : > { %s188_s6 = scalar_lea.hbm %s1992_s0, %s1021_s30  ;;  %s179_s7 = scalar_lea.vmem [#allocation2], %s1010_s29 }
  0x13   : > { %s189_s8 = sshll.u32 %s179_s7, 4  ;;  %p1304_p0 = pnand %p1035_p13, %p1274_p4  ;;  %s190_s8 = int_to_ptr.vmem [resolvable:$true] %s189_s8 }
  0x14   : > { %p1013_p1 = scmp.ge.s32.totalorder %s1204_s17, 1  ;;  %s176_s10 = scalar_lea.sflag [#allocation3], %s175_s28 }
  0x15   : > { %p1098_p2 = pneg %p1304_p0  ;;  %s1109_s11 = scalar_lea.vmem %s190_s8, 8192 }
  0x16   : > { %p1110_p3 = scmp.ne.s32.totalorder %s190_s8, %s1109_s11  ;;  %s1206_s18 = smov [#allocation2]  }
  0x17   : > { %s1114_s19 = sshll.u32 %s1206_s18, 4  ;;  %s1115_s19 = int_to_ptr.vmem [resolvable:$false] %s1114_s19 }
  0x18   : > { %p1112_p5 = pnand %p1110_p3, %p1098_p2  ;;  %s1116_s21 = scalar_lea.vmem %s1115_s19, 16384 }
  0x19   : > { %p1117_p7 = scmp.lt.s32.totalorder %s190_s8, %s1115_s19  ;;  %p1118_p10 = scmp.lt.s32.totalorder %s1116_s21, %s1109_s11 }
  0x1a   : > { %p1113_p6 = pneg %p1112_p5 }
  0x1b   : > { %p1119_p12 = por %p1118_p10, %p1117_p7 }
  0x1d   : > { %p1120_p4 = pnand %p1119_p12, %p1113_p6 }
  0x1f   : > { %1123 = shalt.err (!%p1120_p4)
}
  0x20   : > { %s1207_s22 = smov 256   ;;  %s1208_s23 = smov 16  }
  0x21   : > { %1030 = dma.hbm_to_vmem [thread:$0]  (!%p1304_p0), %s188_s6, 8192, %s190_s8, %s176_s10, %s1207_s22, %s1207_s22, %s1208_s23  }
  0x22   : > { %p197_p13 = scmp.lt.s32.totalorder %s1204_s17, 3 }
  0x24   : > { %p198_p2 = pnand %p1013_p1, %p197_p13 }
  0x26   : > { %201 = sbr.rel (%p198_p2) target bundleno = 521 (0x209), region = 32 }
  0x2b   : > { %s1317_s28 = sand.u32 1, %s1188_s13  }
  0x2c   : > { %s1014_s29 = sshll.u32 %s1317_s28, 9  ;;  %s204_s30 = scalar_lea.sflag [#allocation3], %s1317_s28 }
  0x2d   : > { %s1323_s4 = scalar_lea.vmem [#allocation2], %s1014_s29 }
  0x2e   : > { %1175 = dma.done.wait (%p1280_p8), %s204_s30, 8192  }
  0x2f   : > { %1177 = vsyncadd (%p1280_p8), %s204_s30, 4294959104  ;;  %v1330_v0 = vld [vmem:[%s1323_s4 + $0x20] sm:$0xff]  ;;  %v1333_v1 = vld [vmem:[%s1323_s4 + $0x28] sm:$0xff]  ;;  %s1777_s18 = scalar_lea.vmem [#allocation5], %s1014_s29  ;;  %s1022_s19 = sshll.u32 %s1196_s15, 13 }
  0x30   : > { %v1336_v2 = vld [vmem:[%s1323_s4] sm:$0xff]  ;;  %v324_v3 = vadd.f32 %v1333_v1, %v1330_v0  ;;  %v1341_v4 = vld [vmem:[%s1323_s4 + $0x8] sm:$0xff]  ;;  %v1344_v5 = vld [vmem:[%s1323_s4 + $0x30] sm:$0xff]  ;;  %v418_v26 = vmul.f32 %v1330_v0, %v1330_v0  ;;  %v419_v27 = vmul.f32 %v1333_v1, %v1333_v1  ;;  %s887_s21 = sshll.u32 %s1777_s18, 4  ;;  %s1926_s23 = scalar_lea.hbm %s1995_s3, %s1022_s19  ;;  %s1928_s21 = int_to_ptr.vmem [resolvable:$true] %s887_s21 }
  0x31   : > { %v1347_v6 = vld [vmem:[%s1323_s4 + $0x38] sm:$0xff]  ;;  %v318_v7 = vadd.f32 %v1341_v4, %v1336_v2  ;;  %v1352_v8 = vld [vmem:[%s1323_s4 + $0x10] sm:$0xff]  ;;  %v1368_v14 = vld [vmem:[%s1323_s4 + $0x40] sm:$0xff]  ;;  %v414_v20 = vmul.f32 %v1336_v2, %v1336_v2  ;;  %v415_v21 = vmul.f32 %v1341_v4, %v1341_v4  ;;  %v420_v23 = vmul.f32 %v1344_v5, %v1344_v5  ;;  %s871_s29 = scalar_lea.sflag [#allocation4], %s1317_s28  ;;  %s1124_s30 = scalar_lea.vmem %s1928_s21, 8192 }
  0x32   : > { %v1355_v9 = vld [vmem:[%s1323_s4 + $0x18] sm:$0xff]  ;;  %325 = vadd.xlane.f32.xlu1 %v324_v3  ;;  %v327_v10 = vadd.f32 %v1347_v6, %v1344_v5  ;;  %v1362_v12 = vld [vmem:[%s1323_s4 + $0x50] sm:$0xff]  ;;  %v1371_v15 = vld [vmem:[%s1323_s4 + $0x48] sm:$0xff]  ;;  %v416_v17 = vmul.f32 %v1352_v8, %v1352_v8  ;;  %v421_v24 = vmul.f32 %v1347_v6, %v1347_v6  ;;  %v484_v29 = vadd.f32 %v419_v27, %v418_v26  ;;  %p1125_p8 = scmp.ne.s32.totalorder %s1928_s21, %s1124_s30 }
  0x33   : > { %319 = vadd.xlane.f32.xlu0 %v318_v7  ;;  %v321_v11 = vadd.f32 %v1355_v9, %v1352_v8  ;;  %2056 = vst [vmem:[#allocation8_spill] sm:$0xff] %v1362_v12  ;;  %v1365_v13 = vld [vmem:[%s1323_s4 + $0x58] sm:$0xff]  ;;  %2058 = vst [vmem:[#allocation10_spill] sm:$0xff] %v1371_v15  ;;  %v417_v18 = vmul.f32 %v1355_v9, %v1355_v9  ;;  %v330_v19 = vadd.f32 %v1371_v15, %v1368_v14  ;;  %v1394_v30 = vld [vmem:[%s1323_s4 + $0x70] sm:$0xff] }
  0x34   : > { %2057 = vst [vmem:[#allocation9_spill] sm:$0xff] %v1365_v13  ;;  %v333_v16 = vadd.f32 %v1365_v13, %v1362_v12  ;;  %v478_v25 = vadd.f32 %v415_v21, %v414_v20  ;;  %v487_v28 = vadd.f32 %v421_v24, %v420_v23  ;;  %2059 = vst [vmem:[#allocation11_spill] sm:$0xff] %v1394_v30  ;;  %v1397_v31 = vld [vmem:[%s1323_s4 + $0x78] sm:$0xff]  ;;  %v1400_v32 = vld [vmem:[%s1323_s4 + $0x60] sm:$0xff]  ;;  %p1126_p12 = pnand %p1125_p8, %p1284_p9 }
  0x35   : > { %v481_v22 = vadd.f32 %v417_v18, %v416_v17  ;;  %2060 = vst [vmem:[#allocation12_spill] sm:$0xff] %v1397_v31  ;;  %2061 = vst [vmem:[#allocation13_spill] sm:$0xff] %v1400_v32  ;;  %v1403_v33 = vld [vmem:[%s1323_s4 + $0x68] sm:$0xff]  ;;  %v339_v34 = vadd.f32 %v1397_v31, %v1394_v30  ;;  %v424_v35 = vmul.f32 %v1362_v12, %v1362_v12  ;;  %v1418_v42 = vld [vmem:[%s1323_s4 + $0x90] sm:$0xff] }
  0x36   : > { %328 = vadd.xlane.f32.xlu1 %v327_v10  ;;  %2062 = vst [vmem:[#allocation14_spill] sm:$0xff] %v1403_v33  ;;  %v425_v36 = vmul.f32 %v1365_v13, %v1365_v13  ;;  %v336_v37 = vadd.f32 %v1403_v33, %v1400_v32  ;;  %v422_v38 = vmul.f32 %v1368_v14, %v1368_v14  ;;  %2063 = vst [vmem:[#allocation15_spill] sm:$0xff] %v1418_v42  ;;  %v1421_v43 = vld [vmem:[%s1323_s4 + $0x98] sm:$0xff]  ;;  %v1424_v44 = vld [vmem:[%s1323_s4 + $0x80] sm:$0xff]  ;;  %p1127_p0 = pneg %p1126_p12 }
  0x37   : > { %322 = vadd.xlane.f32.xlu0 %v321_v11  ;;  %v423_v39 = vmul.f32 %v1371_v15, %v1371_v15  ;;  %2064 = vst [vmem:[#allocation16_spill] sm:$0xff] %v1421_v43  ;;  %2065 = vst [vmem:[#allocation17_spill] sm:$0xff] %v1424_v44  ;;  %v1427_v45 = vld [vmem:[%s1323_s4 + $0x88] sm:$0xff]  ;;  %v345_v46 = vadd.f32 %v1421_v43, %v1418_v42  ;;  %v428_v47 = vmul.f32 %v1394_v30, %v1394_v30  ;;  %v1442_v54 = vld [vmem:[%s1323_s4 + $0xb0] sm:$0xff] }
  0x38   : > { %v493_v40 = vadd.f32 %v425_v36, %v424_v35  ;;  %2066 = vst [vmem:[#allocation18_spill] sm:$0xff] %v1427_v45  ;;  %v429_v48 = vmul.f32 %v1397_v31, %v1397_v31  ;;  %v342_v49 = vadd.f32 %v1427_v45, %v1424_v44  ;;  %v426_v50 = vmul.f32 %v1400_v32, %v1400_v32  ;;  %v1445_v55 = vld [vmem:[%s1323_s4 + $0xb8] sm:$0xff]  ;;  %v1448_v56 = vld [vmem:[%s1323_s4 + $0xa0] sm:$0xff]  ;;  %v1451_v57 = vld [vmem:[%s1323_s4 + $0xa8] sm:$0xff] }
  0x39   : > { %v490_v41 = vadd.f32 %v423_v39, %v422_v38  ;;  %v427_v51 = vmul.f32 %v1403_v33, %v1403_v33  ;;  %2067 = vst [vmem:[#allocation19_spill] sm:$0xff] %v1442_v54  ;;  %2068 = vst [vmem:[#allocation20_spill] sm:$0xff] %v1445_v55  ;;  %v351_v58 = vadd.f32 %v1445_v55, %v1442_v54  ;;  %v1466_v10 = vld [vmem:[%s1323_s4 + $0xd0] sm:$0xff]  ;;  %v1469_v11 = vld [vmem:[%s1323_s4 + $0xd8] sm:$0xff] }
  0x3a   : > { %334 = vadd.xlane.f32.xlu1 %v333_v16  ;;  %v499_v52 = vadd.f32 %v429_v48, %v428_v47  ;;  %2069 = vst [vmem:[#allocation21_spill] sm:$0xff] %v1448_v56  ;;  %2070 = vst [vmem:[#allocation22_spill] sm:$0xff] %v1451_v57  ;;  %v432_v59 = vmul.f32 %v1418_v42, %v1418_v42  ;;  %v433_v60 = vmul.f32 %v1421_v43, %v1421_v43  ;;  %v1472_v16 = vld [vmem:[%s1323_s4 + $0xc0] sm:$0xff]  ;;  %v1475_v17 = vld [vmem:[%s1323_s4 + $0xc8] sm:$0xff] }
  0x3b   : > { %331 = vadd.xlane.f32.xlu0 %v330_v19  ;;  %v496_v53 = vadd.f32 %v427_v51, %v426_v50  ;;  %v348_v61 = vadd.f32 %v1451_v57, %v1448_v56  ;;  %v430_v62 = vmul.f32 %v1424_v44, %v1424_v44  ;;  %v431_v63 = vmul.f32 %v1427_v45, %v1427_v45  ;;  %v1490_v26 = vld [vmem:[%s1323_s4 + $0xf0] sm:$0xff]  ;;  %v1493_v27 = vld [vmem:[%s1323_s4 + $0xf8] sm:$0xff]  ;;  %v1520_v48 = vld [vmem:[%s1323_s4 + $0x100] sm:$0xff] }
  0x3c   : > { %v505_v3 = vadd.f32 %v433_v60, %v432_v59  ;;  %2071 = vst [vmem:[#allocation23_spill] sm:$0xff] %v1466_v10  ;;  %2072 = vst [vmem:[#allocation24_spill] sm:$0xff] %v1469_v11  ;;  %v357_v18 = vadd.f32 %v1469_v11, %v1466_v10  ;;  %v436_v19 = vmul.f32 %v1442_v54, %v1442_v54  ;;  %v1517_v47 = vld [vmem:[%s1323_s4 + $0x118] sm:$0xff] }
  0x3d   : > { %v502_v7 = vadd.f32 %v431_v63, %v430_v62  ;;  %2073 = vst [vmem:[#allocation25_spill] sm:$0xff] %v1472_v16  ;;  %2074 = vst [vmem:[#allocation26_spill] sm:$0xff] %v1475_v17  ;;  %v437_v20 = vmul.f32 %v1445_v55, %v1445_v55  ;;  %v354_v21 = vadd.f32 %v1475_v17, %v1472_v16  ;;  %v1538_v62 = vld [vmem:[%s1323_s4 + $0x130] sm:$0xff]  ;;  %v1541_v63 = vld [vmem:[%s1323_s4 + $0x138] sm:$0xff] }
  0x3e   : > { %482 = vadd.xlane.f32.xlu1 %v481_v22  ;;  %v434_v22 = vmul.f32 %v1448_v56, %v1448_v56  ;;  %v435_v23 = vmul.f32 %v1451_v57, %v1451_v57  ;;  %2075 = vst [vmem:[#allocation27_spill] sm:$0xff] %v1490_v26  ;;  %2076 = vst [vmem:[#allocation28_spill] sm:$0xff] %v1493_v27  ;;  %v440_v35 = vmul.f32 %v1466_v10, %v1466_v10 }
  0x3f   : > { %479 = vadd.xlane.f32.xlu0 %v478_v25  ;;  %v511_v24 = vadd.f32 %v437_v20, %v436_v19  ;;  %v441_v36 = vmul.f32 %v1469_v11, %v1469_v11  ;;  %v438_v38 = vmul.f32 %v1472_v16, %v1472_v16  ;;  %v439_v39 = vmul.f32 %v1475_v17, %v1475_v17 }
  0x40   : > { %v508_v25 = vadd.f32 %v435_v23, %v434_v22  ;;  %2080 = vst [vmem:[#allocation32_spill] sm:$0xff] %v1517_v47  ;;  %2081 = vst [vmem:[#allocation33_spill] sm:$0xff] %v1520_v48  ;;  %v444_v51 = vmul.f32 %v1490_v26, %v1490_v26  ;;  %v449_v20 = vmul.f32 %v1517_v47, %v1517_v47 }
  0x41   : > { %2083 = vst [vmem:[#allocation35_spill] sm:$0xff] %v1538_v62  ;;  %2084 = vst [vmem:[#allocation36_spill] sm:$0xff] %v1541_v63  ;;  %v446_v22 = vmul.f32 %v1520_v48, %v1520_v48 }
  0x42   : > { %488 = vadd.xlane.f32.xlu1 %v487_v28  ;;  %v1496_v28 = vld [vmem:[%s1323_s4 + $0xe0] sm:$0xff] }
  0x43   : > { %485 = vadd.xlane.f32.xlu0 %v484_v29  ;;  %2077 = vst [vmem:[#allocation29_spill] sm:$0xff] %v1496_v28  ;;  %v1499_v29 = vld [vmem:[%s1323_s4 + $0xe8] sm:$0xff] }
  0x44   : > { %2078 = vst [vmem:[#allocation30_spill] sm:$0xff] %v1499_v29  ;;  %v443_v59 = vmul.f32 %v1499_v29, %v1499_v29 }
  0x46   : > { %340 = vadd.xlane.f32.xlu1 %v339_v34  ;;  %v363_v34 = vadd.f32 %v1493_v27, %v1490_v26  ;;  %v1209_v26 = vmov 0  }
  0x47   : > { %337 = vadd.xlane.f32.xlu0 %v336_v37  ;;  %v360_v37 = vadd.f32 %v1499_v29, %v1496_v28  ;;  %1091 = vset.pattern.permute.xlu1 %v1209_v26 }
  0x48   : > { %1090 = vset.pattern.permute.xlu0 %v1209_v26 }
  0x4a   : > { %494 = vadd.xlane.f32.xlu1 %v493_v40  ;;  %v517_v40 = vadd.f32 %v441_v36, %v440_v35  ;;  %v1565_v35 = vld [vmem:[%s1323_s4 + $0x158] sm:$0xff]  ;;  %v1568_v36 = vld [vmem:[%s1323_s4 + $0x140] sm:$0xff] }
  0x4b   : > { %491 = vadd.xlane.f32.xlu0 %v490_v41  ;;  %v514_v41 = vadd.f32 %v439_v39, %v438_v38  ;;  %2088 = vst [vmem:[#allocation40_spill] sm:$0xff] %v1565_v35  ;;  %2089 = vst [vmem:[#allocation41_spill] sm:$0xff] %v1568_v36  ;;  %v452_v39 = vmul.f32 %v1538_v62, %v1538_v62 }
  0x4e   : > { %346 = vadd.xlane.f32.xlu1 %v345_v46  ;;  %v1514_v46 = vld [vmem:[%s1323_s4 + $0x110] sm:$0xff] }
  0x4f   : > { %343 = vadd.xlane.f32.xlu0 %v342_v49  ;;  %2079 = vst [vmem:[#allocation31_spill] sm:$0xff] %v1514_v46  ;;  %v1523_v49 = vld [vmem:[%s1323_s4 + $0x108] sm:$0xff]  ;;  %v369_v50 = vadd.f32 %v1517_v47, %v1514_v46  ;;  %v448_v19 = vmul.f32 %v1514_v46, %v1514_v46 }
  0x50   : > { %2082 = vst [vmem:[#allocation34_spill] sm:$0xff] %v1523_v49  ;;  %v447_v23 = vmul.f32 %v1523_v49, %v1523_v49 }
  0x52   : > { %500 = vadd.xlane.f32.xlu1 %v499_v52  ;;  %v445_v52 = vmul.f32 %v1493_v27, %v1493_v27 }
  0x53   : > { %497 = vadd.xlane.f32.xlu0 %v496_v53  ;;  %v366_v53 = vadd.f32 %v1523_v49, %v1520_v48 }
  0x54   : > { %v523_v60 = vadd.f32 %v445_v52, %v444_v51 }
  0x56   : > { %352 = vadd.xlane.f32.xlu1 %v351_v58  ;;  %v442_v58 = vmul.f32 %v1496_v28, %v1496_v28 }
  0x57   : > { %349 = vadd.xlane.f32.xlu0 %v348_v61 }
  0x58   : > { %v520_v61 = vadd.f32 %v443_v59, %v442_v58  ;;  %v1586_v58 = vld [vmem:[%s1323_s4 + $0x170] sm:$0xff]  ;;  %v1589_v59 = vld [vmem:[%s1323_s4 + $0x178] sm:$0xff] }
  0x59   : > { %2091 = vst [vmem:[#allocation43_spill] sm:$0xff] %v1586_v58  ;;  %2092 = vst [vmem:[#allocation44_spill] sm:$0xff] %v1589_v59 }
  0x5a   : > { %506 = vadd.xlane.f32.xlu1 %v505_v3  ;;  %v1544_v3 = vld [vmem:[%s1323_s4 + $0x120] sm:$0xff] }
  0x5b   : > { %503 = vadd.xlane.f32.xlu0 %v502_v7  ;;  %2085 = vst [vmem:[#allocation37_spill] sm:$0xff] %v1544_v3  ;;  %v1547_v7 = vld [vmem:[%s1323_s4 + $0x128] sm:$0xff] }
  0x5c   : > { %2086 = vst [vmem:[#allocation38_spill] sm:$0xff] %v1547_v7  ;;  %v451_v51 = vmul.f32 %v1547_v7, %v1547_v7 }
  0x5e   : > { %358 = vadd.xlane.f32.xlu1 %v357_v18  ;;  %v375_v18 = vadd.f32 %v1541_v63, %v1538_v62 }
  0x5f   : > { %355 = vadd.xlane.f32.xlu0 %v354_v21  ;;  %v372_v21 = vadd.f32 %v1547_v7, %v1544_v3 }
  0x62   : > { %512 = vadd.xlane.f32.xlu1 %v511_v24  ;;  %v529_v24 = vadd.f32 %v449_v20, %v448_v19  ;;  %v457_v20 = vmul.f32 %v1565_v35, %v1565_v35 }
  0x63   : > { %509 = vadd.xlane.f32.xlu0 %v508_v25  ;;  %v526_v25 = vadd.f32 %v447_v23, %v446_v22  ;;  %v454_v22 = vmul.f32 %v1568_v36, %v1568_v36 }
  0x66   : > { %364 = vadd.xlane.f32.xlu1 %v363_v34  ;;  %v1562_v34 = vld [vmem:[%s1323_s4 + $0x150] sm:$0xff] }
  0x67   : > { %361 = vadd.xlane.f32.xlu0 %v360_v37  ;;  %2087 = vst [vmem:[#allocation39_spill] sm:$0xff] %v1562_v34  ;;  %v1571_v37 = vld [vmem:[%s1323_s4 + $0x148] sm:$0xff]  ;;  %v381_v38 = vadd.f32 %v1565_v35, %v1562_v34  ;;  %v456_v19 = vmul.f32 %v1562_v34, %v1562_v34  ;;  %v1682_v34 = vld [vmem:[%s1323_s4 + $0x1f0] sm:$0xff] }
  0x68   : > { %2090 = vst [vmem:[#allocation42_spill] sm:$0xff] %v1571_v37  ;;  %v455_v23 = vmul.f32 %v1571_v37, %v1571_v37  ;;  %2107 = vst [vmem:[#allocation59_spill] sm:$0xff] %v1682_v34 }
  0x6a   : > { %518 = vadd.xlane.f32.xlu1 %v517_v40  ;;  %v453_v40 = vmul.f32 %v1541_v63, %v1541_v63  ;;  %v1688_v63 = vld [vmem:[%s1323_s4 + $0x1e0] sm:$0xff] }
  0x6b   : > { %515 = vadd.xlane.f32.xlu0 %v514_v41  ;;  %v378_v41 = vadd.f32 %v1571_v37, %v1568_v36  ;;  %2109 = vst [vmem:[#allocation61_spill] sm:$0xff] %v1688_v63 }
  0x6c   : > { %v535_v52 = vadd.f32 %v453_v40, %v452_v39  ;;  %v1613_v39 = vld [vmem:[%s1323_s4 + $0x198] sm:$0xff]  ;;  %v1616_v40 = vld [vmem:[%s1323_s4 + $0x180] sm:$0xff] }
  0x6d   : > { %2096 = vst [vmem:[#allocation48_spill] sm:$0xff] %v1613_v39  ;;  %2097 = vst [vmem:[#allocation49_spill] sm:$0xff] %v1616_v40 }
  0x6e   : > { %370 = vadd.xlane.f32.xlu1 %v369_v50  ;;  %v450_v50 = vmul.f32 %v1544_v3, %v1544_v3 }
  0x6f   : > { %367 = vadd.xlane.f32.xlu0 %v366_v53 }
  0x70   : > { %v532_v53 = vadd.f32 %v451_v51, %v450_v50  ;;  %v460_v51 = vmul.f32 %v1586_v58, %v1586_v58 }
  0x72   : > { %524 = vadd.xlane.f32.xlu1 %v523_v60  ;;  %v1592_v60 = vld [vmem:[%s1323_s4 + $0x160] sm:$0xff] }
  0x73   : > { %521 = vadd.xlane.f32.xlu0 %v520_v61  ;;  %2093 = vst [vmem:[#allocation45_spill] sm:$0xff] %v1592_v60  ;;  %v1595_v61 = vld [vmem:[%s1323_s4 + $0x168] sm:$0xff] }
  0x74   : > { %2094 = vst [vmem:[#allocation46_spill] sm:$0xff] %v1595_v61 }
  0x76   : > { %376 = vadd.xlane.f32.xlu1 %v375_v18  ;;  %v387_v18 = vadd.f32 %v1589_v59, %v1586_v58  ;;  %v1658_v58 = vld [vmem:[%s1323_s4 + $0x1d0] sm:$0xff] }
  0x77   : > { %373 = vadd.xlane.f32.xlu0 %v372_v21  ;;  %v384_v21 = vadd.f32 %v1595_v61, %v1592_v60  ;;  %2103 = vst [vmem:[#allocation55_spill] sm:$0xff] %v1658_v58  ;;  %v472_v62 = vmul.f32 %v1658_v58, %v1658_v58 }
  0x7a   : > { %530 = vadd.xlane.f32.xlu1 %v529_v24  ;;  %v541_v24 = vadd.f32 %v457_v20, %v456_v19  ;;  %v459_v19 = vmul.f32 %v1595_v61, %v1595_v61 }
  0x7b   : > { %527 = vadd.xlane.f32.xlu0 %v526_v25  ;;  %v538_v25 = vadd.f32 %v455_v23, %v454_v22  ;;  %v1634_v22 = vld [vmem:[%s1323_s4 + $0x1b0] sm:$0xff]  ;;  %v1637_v23 = vld [vmem:[%s1323_s4 + $0x1b8] sm:$0xff] }
  0x7c   : > { %2099 = vst [vmem:[#allocation51_spill] sm:$0xff] %v1634_v22  ;;  %2100 = vst [vmem:[#allocation52_spill] sm:$0xff] %v1637_v23 }
  0x7e   : > { %382 = vadd.xlane.f32.xlu1 %v381_v38  ;;  %v1610_v38 = vld [vmem:[%s1323_s4 + $0x190] sm:$0xff] }
  0x7f   : > { %379 = vadd.xlane.f32.xlu0 %v378_v41  ;;  %2095 = vst [vmem:[#allocation47_spill] sm:$0xff] %v1610_v38  ;;  %v1619_v41 = vld [vmem:[%s1323_s4 + $0x188] sm:$0xff]  ;;  %v393_v50 = vadd.f32 %v1613_v39, %v1610_v38 }
  0x80   : > { %2098 = vst [vmem:[#allocation50_spill] sm:$0xff] %v1619_v41 }
  0x82   : > { %536 = vadd.xlane.f32.xlu1 %v535_v52  ;;  %v461_v52 = vmul.f32 %v1589_v59, %v1589_v59  ;;  %v399_v59 = vadd.f32 %v1637_v23, %v1634_v22 }
  0x83   : > { %533 = vadd.xlane.f32.xlu0 %v532_v53  ;;  %v390_v53 = vadd.f32 %v1619_v41, %v1616_v40 }
  0x84   : > { %v547_v20 = vadd.f32 %v461_v52, %v460_v51  ;;  %v465_v51 = vmul.f32 %v1613_v39, %v1613_v39  ;;  %v1667_v39 = vld [vmem:[%s1323_s4 + $0x1c8] sm:$0xff] }
  0x85   : > { %2106 = vst [vmem:[#allocation58_spill] sm:$0xff] %v1667_v39 }
  0x86   : > { %388 = vadd.xlane.f32.xlu1 %v387_v18  ;;  %v458_v18 = vmul.f32 %v1592_v60, %v1592_v60 }
  0x87   : > { %385 = vadd.xlane.f32.xlu0 %v384_v21 }
  0x88   : > { %v544_v21 = vadd.f32 %v459_v19, %v458_v18  ;;  %v463_v18 = vmul.f32 %v1619_v41, %v1619_v41 }
  0x8a   : > { %542 = vadd.xlane.f32.xlu1 %v541_v24  ;;  %v1640_v24 = vld [vmem:[%s1323_s4 + $0x1a0] sm:$0xff] }
  0x8b   : > { %539 = vadd.xlane.f32.xlu0 %v538_v25  ;;  %2101 = vst [vmem:[#allocation53_spill] sm:$0xff] %v1640_v24  ;;  %v1643_v25 = vld [vmem:[%s1323_s4 + $0x1a8] sm:$0xff] }
  0x8c   : > { %2102 = vst [vmem:[#allocation54_spill] sm:$0xff] %v1643_v25  ;;  %v396_v52 = vadd.f32 %v1643_v25, %v1640_v24 }
  0x8e   : > { %394 = vadd.xlane.f32.xlu1 %v393_v50  ;;  %v464_v50 = vmul.f32 %v1610_v38, %v1610_v38  ;;  %v1661_v38 = vld [vmem:[%s1323_s4 + $0x1d8] sm:$0xff] }
  0x8f   : > { %391 = vadd.xlane.f32.xlu0 %v390_v53  ;;  %v462_v53 = vmul.f32 %v1616_v40, %v1616_v40  ;;  %2104 = vst [vmem:[#allocation56_spill] sm:$0xff] %v1661_v38  ;;  %v405_v35 = vadd.f32 %v1661_v38, %v1658_v58 }
  0x90   : > { %v553_v19 = vadd.f32 %v465_v51, %v464_v50  ;;  %v469_v50 = vmul.f32 %v1637_v23, %v1637_v23 }
  0x92   : > { %548 = vadd.xlane.f32.xlu1 %v547_v20  ;;  %v550_v20 = vadd.f32 %v463_v18, %v462_v53  ;;  %v467_v53 = vmul.f32 %v1643_v25, %v1643_v25 }
  0x93   : > { %545 = vadd.xlane.f32.xlu0 %v544_v21  ;;  %v1664_v21 = vld [vmem:[%s1323_s4 + $0x1c0] sm:$0xff] }
  0x94   : > { %2105 = vst [vmem:[#allocation57_spill] sm:$0xff] %v1664_v21  ;;  %v402_v51 = vadd.f32 %v1667_v39, %v1664_v21 }
  0x96   : > { %400 = vadd.xlane.f32.xlu1 %v399_v59  ;;  %v468_v59 = vmul.f32 %v1634_v22, %v1634_v22  ;;  %v1685_v22 = vld [vmem:[%s1323_s4 + $0x1f8] sm:$0xff] }
  0x97   : > { %397 = vadd.xlane.f32.xlu0 %v396_v52  ;;  %v466_v52 = vmul.f32 %v1640_v24, %v1640_v24  ;;  %2108 = vst [vmem:[#allocation60_spill] sm:$0xff] %v1685_v22  ;;  %v411_v23 = vadd.f32 %v1685_v22, %v1682_v34 }
  0x98   : > { %v559_v18 = vadd.f32 %v469_v50, %v468_v59  ;;  %v470_v50 = vmul.f32 %v1664_v21, %v1664_v21 }
  0x9a   : > { %554 = vadd.xlane.f32.xlu1 %v553_v19  ;;  %v556_v19 = vadd.f32 %v467_v53, %v466_v52  ;;  %v476_v53 = vmul.f32 %v1682_v34, %v1682_v34 }
  0x9b   : > { %551 = vadd.xlane.f32.xlu0 %v550_v20  ;;  %v1691_v20 = vld [vmem:[%s1323_s4 + $0x1e8] sm:$0xff]  ;;  %s1210_s4 = smov [#allocation5]  }
  0x9c   : > { %2110 = vst [vmem:[#allocation62_spill] sm:$0xff] %v1691_v20  ;;  %v408_v59 = vadd.f32 %v1691_v20, %v1688_v63  ;;  %v475_v58 = vmul.f32 %v1691_v20, %v1691_v20  ;;  %s1128_s24 = sshll.u32 %s1210_s4, 4  ;;  %s1129_s24 = int_to_ptr.vmem [resolvable:$false] %s1128_s24 }
  0x9d   : > { %s1130_s5 = scalar_lea.vmem %s1129_s24, 16384  ;;  %p1131_p1 = scmp.lt.s32.totalorder %s1928_s21, %s1129_s24 }
  0x9e   : > { %406 = vadd.xlane.f32.xlu1 %v405_v35  ;;  %v473_v35 = vmul.f32 %v1661_v38, %v1661_v38  ;;  %p1132_p3 = scmp.lt.s32.totalorder %s1130_s5, %s1124_s30 }
  0x9f   : > { %403 = vadd.xlane.f32.xlu0 %v402_v51  ;;  %v471_v51 = vmul.f32 %v1667_v39, %v1667_v39 }
  0xa0   : > { %v565_v52 = vadd.f32 %v473_v35, %v472_v62  ;;  %p1133_p5 = por %p1132_p3, %p1131_p1 }
  0xa1   : > { %v562_v38 = vadd.f32 %v471_v51, %v470_v50 }
  0xa2   : > { %560 = vadd.xlane.f32.xlu1 %v559_v18  ;;  %v477_v18 = vmul.f32 %v1685_v22, %v1685_v22  ;;  %p1134_p6 = pnand %p1133_p5, %p1127_p0 }
  0xa3   : > { %557 = vadd.xlane.f32.xlu0 %v556_v19  ;;  %v474_v19 = vmul.f32 %v1688_v63, %v1688_v63 }
  0xa4   : > { %v571_v47 = vadd.f32 %v477_v18, %v476_v53 }
  0xa5   : > { %v568_v46 = vadd.f32 %v475_v58, %v474_v19 }
  0xa6   : > { %412 = vadd.xlane.f32.xlu1 %v411_v23 }
  0xa7   : > { %409 = vadd.xlane.f32.xlu0 %v408_v59 }
  0xaa   : > { %566 = vadd.xlane.f32.xlu1 %v565_v52 }
  0xab   : > { %563 = vadd.xlane.f32.xlu0 %v562_v38 }
  0xae   : > { %572 = vadd.xlane.f32.xlu1 %v571_v47 }
  0xaf   : > { %569 = vadd.xlane.f32.xlu0 %v568_v46 }
  0xbb   : > { %v326_v62 = vpop.xlane.xlu1 %325 }
  0xbc   : > { %v320_v23 = vpop.xlane.xlu0 %319 }
  0xbd   : > { %v574_v35 = vadd.f32 %v326_v62, %v320_v23 }
  0xbf   : > { %v329_v34 = vpop.xlane.xlu1 %328 }
  0xc0   : > { %v323_v27 = vpop.xlane.xlu0 %322 }
  0xc1   : > { %v589_v22 = vadd.f32 %v329_v34, %v323_v27 }
  0xc3   : > { %v335_v59 = vpop.xlane.xlu1 %334 }
  0xc4   : > { %v590_v50 = vadd.f32 %v589_v22, %v335_v59  ;;  %v332_v51 = vpop.xlane.xlu0 %331 }
  0xc5   : > { %v575_v11 = vadd.f32 %v574_v35, %v332_v51 }
  0xc7   : > { %v483_v10 = vpop.xlane.xlu1 %482 }
  0xc8   : > { %v480_v52 = vpop.xlane.xlu0 %479 }
  0xcb   : > { %v489_v53 = vpop.xlane.xlu1 %488 }
  0xcc   : > { %v621_v38 = vadd.f32 %v489_v53, %v483_v10  ;;  %v486_v58 = vpop.xlane.xlu0 %485 }
  0xcd   : > { %v606_v47 = vadd.f32 %v486_v58, %v480_v52 }
  0xcf   : > { %v341_v46 = vpop.xlane.xlu1 %340 }
  0xd0   : > { %v591_v18 = vadd.f32 %v590_v50, %v341_v46  ;;  %v338_v19 = vpop.xlane.xlu0 %337 }
  0xd1   : > { %v576_v62 = vadd.f32 %v575_v11, %v338_v19 }
  0xd3   : > { %v495_v23 = vpop.xlane.xlu1 %494 }
  0xd4   : > { %v622_v55 = vadd.f32 %v621_v38, %v495_v23  ;;  %v492_v27 = vpop.xlane.xlu0 %491 }
  0xd5   : > { %v607_v34 = vadd.f32 %v606_v47, %v492_v27 }
  0xd7   : > { %v347_v22 = vpop.xlane.xlu1 %346 }
  0xd8   : > { %v592_v59 = vadd.f32 %v591_v18, %v347_v22  ;;  %v344_v54 = vpop.xlane.xlu0 %343 }
  0xd9   : > { %v577_v43 = vadd.f32 %v576_v62, %v344_v54 }
  0xdb   : > { %v501_v26 = vpop.xlane.xlu1 %500 }
  0xdc   : > { %v623_v35 = vadd.f32 %v622_v55, %v501_v26  ;;  %v498_v51 = vpop.xlane.xlu0 %497 }
  0xdd   : > { %v608_v42 = vadd.f32 %v607_v34, %v498_v51 }
  0xdf   : > { %v353_v31 = vpop.xlane.xlu1 %352 }
  0xe0   : > { %v593_v10 = vadd.f32 %v592_v59, %v353_v31  ;;  %v350_v53 = vpop.xlane.xlu0 %349 }
  0xe1   : > { %v578_v52 = vadd.f32 %v577_v43, %v350_v53 }
  0xe3   : > { %v507_v58 = vpop.xlane.xlu1 %506 }
  0xe4   : > { %v504_v50 = vpop.xlane.xlu0 %503  ;;  %v624_v37 = vadd.f32 %v623_v35, %v507_v58 }
  0xe5   : > { %v609_v7 = vadd.f32 %v608_v42, %v504_v50 }
  0xe7   : > { %v359_v46 = vpop.xlane.xlu1 %358 }
  0xe8   : > { %v356_v11 = vpop.xlane.xlu0 %355  ;;  %v594_v40 = vadd.f32 %v593_v10, %v359_v46 }
  0xe9   : > { %v579_v60 = vadd.f32 %v578_v52, %v356_v11 }
  0xeb   : > { %v513_v19 = vpop.xlane.xlu1 %512 }
  0xec   : > { %v510_v38 = vpop.xlane.xlu0 %509  ;;  %v625_v48 = vadd.f32 %v624_v37, %v513_v19 }
  0xed   : > { %v610_v17 = vadd.f32 %v609_v7, %v510_v38 }
  0xef   : > { %v365_v23 = vpop.xlane.xlu1 %364 }
  0xf0   : > { %v362_v47 = vpop.xlane.xlu0 %361  ;;  %v595_v36 = vadd.f32 %v594_v40, %v365_v23 }
  0xf1   : > { %v580_v3 = vadd.f32 %v579_v60, %v362_v47 }
  0xf3   : > { %v519_v27 = vpop.xlane.xlu1 %518 }
  0xf4   : > { %v516_v18 = vpop.xlane.xlu0 %515  ;;  %v626_v57 = vadd.f32 %v625_v48, %v519_v27 }
  0xf5   : > { %v611_v45 = vadd.f32 %v610_v17, %v516_v18 }
  0xf7   : > { %v371_v22 = vpop.xlane.xlu1 %370 }
  0xf8   : > { %v368_v54 = vpop.xlane.xlu0 %367  ;;  %v596_v29 = vadd.f32 %v595_v36, %v371_v22 }
  0xf9   : > { %v581_v16 = vadd.f32 %v580_v3, %v368_v54 }
  0xfb   : > { %v525_v62 = vpop.xlane.xlu1 %524 }
  0xfc   : > { %v522_v55 = vpop.xlane.xlu0 %521  ;;  %v627_v32 = vadd.f32 %v626_v57, %v525_v62 }
  0xfd   : > { %v612_v46 = vadd.f32 %v611_v45, %v522_v55 }
  0xff   : > { %v377_v26 = vpop.xlane.xlu1 %376 }
 0x100   : > { %v374_v34 = vpop.xlane.xlu0 %373  ;;  %v597_v56 = vadd.f32 %v596_v29, %v377_v26 }
 0x101   : > { %v582_v44 = vadd.f32 %v581_v16, %v374_v34  ;;  %v649_v34 = vld [vmem:[%s1993_s1 + $0x8] sm:$0xff] }
 0x103   : > { %v531_v51 = vpop.xlane.xlu1 %530 }
 0x104   : > { %v528_v31 = vpop.xlane.xlu0 %527  ;;  %v628_v35 = vadd.f32 %v627_v32, %v531_v51  ;;  %v648_v51 = vld [vmem:[%s1993_s1] sm:$0xff] }
 0x105   : > { %v613_v42 = vadd.f32 %v612_v46, %v528_v31 }
 0x107   : > { %v383_v59 = vpop.xlane.xlu1 %382 }
 0x108   : > { %v380_v43 = vpop.xlane.xlu0 %379  ;;  %v598_v15 = vadd.f32 %v597_v56, %v383_v59 }
 0x109   : > { %v583_v52 = vadd.f32 %v582_v44, %v380_v43 }
 0x10b   : > { %v537_v53 = vpop.xlane.xlu1 %536 }
 0x10c   : > { %v534_v30 = vpop.xlane.xlu0 %533  ;;  %v629_v37 = vadd.f32 %v628_v35, %v537_v53 }
 0x10d   : > { %v614_v7 = vadd.f32 %v613_v42, %v534_v30 }
 0x10f   : > { %v389_v13 = vpop.xlane.xlu1 %388 }
 0x110   : > { %v386_v12 = vpop.xlane.xlu0 %385  ;;  %v599_v40 = vadd.f32 %v598_v15, %v389_v13 }
 0x111   : > { %v584_v60 = vadd.f32 %v583_v52, %v386_v12 }
 0x113   : > { %v543_v20 = vpop.xlane.xlu1 %542 }
 0x114   : > { %v540_v63 = vpop.xlane.xlu0 %539  ;;  %v630_v48 = vadd.f32 %v629_v37, %v543_v20 }
 0x115   : > { %v615_v17 = vadd.f32 %v614_v7, %v540_v63 }
 0x117   : > { %v395_v39 = vpop.xlane.xlu1 %394 }
 0x118   : > { %v392_v21 = vpop.xlane.xlu0 %391  ;;  %v600_v36 = vadd.f32 %v599_v40, %v395_v39  ;;  %v653_v40 = vld [vmem:[%s1994_s2 + $0x8] sm:$0xff] }
 0x119   : > { %v585_v3 = vadd.f32 %v584_v60, %v392_v21 }
 0x11b   : > { %v549_v25 = vpop.xlane.xlu1 %548 }
 0x11c   : > { %v546_v24 = vpop.xlane.xlu0 %545  ;;  %v631_v57 = vadd.f32 %v630_v48, %v549_v25 }
 0x11d   : > { %v616_v45 = vadd.f32 %v615_v17, %v546_v24 }
 0x11f   : > { %v401_v41 = vpop.xlane.xlu1 %400 }
 0x120   : > { %v398_v61 = vpop.xlane.xlu0 %397  ;;  %v601_v29 = vadd.f32 %v600_v36, %v401_v41 }
 0x121   : > { %v586_v16 = vadd.f32 %v585_v3, %v398_v61 }
 0x123   : > { %v555_v49 = vpop.xlane.xlu1 %554 }
 0x124   : > { %v552_v28 = vpop.xlane.xlu0 %551  ;;  %v632_v32 = vadd.f32 %v631_v57, %v555_v49 }
 0x125   : > { %v617_v15 = vadd.f32 %v616_v45, %v552_v28 }
 0x127   : > { %v407_v33 = vpop.xlane.xlu1 %406 }
 0x128   : > { %v404_v10 = vpop.xlane.xlu0 %403  ;;  %v602_v56 = vadd.f32 %v601_v29, %v407_v33 }
 0x129   : > { %v587_v44 = vadd.f32 %v586_v16, %v404_v10  ;;  %v652_v10 = vld [vmem:[%s1994_s2] sm:$0xff] }
 0x12b   : > { %v561_v58 = vpop.xlane.xlu1 %560 }
 0x12c   : > { %v558_v50 = vpop.xlane.xlu0 %557  ;;  %v633_v23 = vadd.f32 %v632_v32, %v561_v58  ;;  %v2116_v32 = vld [vmem:[#allocation21_spill] sm:$0xff] }
 0x12d   : > { %v618_v47 = vadd.f32 %v617_v15, %v558_v50  ;;  %v2118_v15 = vld [vmem:[#allocation25_spill] sm:$0xff] }
 0x12f   : > { %v413_v11 = vpop.xlane.xlu1 %412 }
 0x130   : > { %v410_v19 = vpop.xlane.xlu0 %409  ;;  %v603_v13 = vadd.f32 %v602_v56, %v413_v11  ;;  %v2112_v11 = vld [vmem:[#allocation13_spill] sm:$0xff] }
 0x131   : > { %v588_v12 = vadd.f32 %v587_v44, %v410_v19  ;;  %v2114_v19 = vld [vmem:[#allocation17_spill] sm:$0xff] }
 0x132   : > { %v605_v30 = vmul.f32 0.00024414063, %v603_v13  ;;  %v2117_v13 = vld [vmem:[#allocation22_spill] sm:$0xff] }
 0x133   : > { %v567_v38 = vpop.xlane.xlu1 %566  ;;  %v604_v20 = vmul.f32 0.00024414063, %v588_v12  ;;  %v2119_v12 = vld [vmem:[#allocation26_spill] sm:$0xff] }
 0x134   : > { %v564_v39 = vpop.xlane.xlu0 %563  ;;  %v634_v21 = vadd.f32 %v633_v23, %v567_v38  ;;  %v639_v33 = vmul.f32 %v605_v30, %v605_v30  ;;  %v2120_v38 = vld [vmem:[#allocation29_spill] sm:$0xff]  ;;  %v2121_v23 = vld [vmem:[#allocation30_spill] sm:$0xff] }
 0x135   : > { %v619_v41 = vadd.f32 %v618_v47, %v564_v39  ;;  %v638_v24 = vmul.f32 %v604_v20, %v604_v20  ;;  %v2122_v47 = vld [vmem:[#allocation33_spill] sm:$0xff] }
 0x137   : > { %v573_v63 = vpop.xlane.xlu1 %572 }
 0x138   : > { %v635_v61 = vadd.f32 %v634_v21, %v573_v63  ;;  %v570_v27 = vpop.xlane.xlu0 %569  ;;  %v2123_v21 = vld [vmem:[#allocation34_spill] sm:$0xff] }
 0x139   : > { %v620_v25 = vadd.f32 %v619_v41, %v570_v27  ;;  %v2124_v41 = vld [vmem:[#allocation37_spill] sm:$0xff] }
 0x13a   : > { %v637_v18 = vmul.f32 0.00024414063, %v635_v61  ;;  %v2125_v61 = vld [vmem:[#allocation38_spill] sm:$0xff] }
 0x13b   : > { %v636_v22 = vmul.f32 0.00024414063, %v620_v25  ;;  %v2126_v25 = vld [vmem:[#allocation41_spill] sm:$0xff] }
 0x13c   : > { %v641_v49 = vsub.f32 %v637_v18, %v639_v33  ;;  %v2127_v18 = vld [vmem:[#allocation42_spill] sm:$0xff] }
 0x13d   : > { %v640_v54 = vsub.f32 %v636_v22, %v638_v24  ;;  %v2128_v22 = vld [vmem:[#allocation45_spill] sm:$0xff] }
 0x13e   : > { %v643_v28 = vmax.f32 %v641_v49, 0.0 }
 0x13f   : > { %v642_v62 = vmax.f32 %v640_v54, 0.0  ;;  %v2129_v54 = vld [vmem:[#allocation46_spill] sm:$0xff] }
 0x140   : > { %v645_v55 = vadd.f32 1e-05, %v643_v28 }
 0x141   : > { %v644_v26 = vadd.f32 1e-05, %v642_v62 }
 0x142   : > { %1092 = vrsqrt.f32 %v645_v55  ;;  %v2130_v55 = vld [vmem:[#allocation49_spill] sm:$0xff] }
 0x143   : > { %1094 = vrsqrt.f32 %v644_v26 }
 0x14f   : > { %v1093_v31 = vpop.eup %1092 }
 0x150   : > { %v1095_v59 = vpop.eup %1094  ;;  %v651_v43 = vmul.f32 %v1093_v31, %v649_v34  ;;  %v2131_v34 = vld [vmem:[#allocation50_spill] sm:$0xff]  ;;  %v2132_v31 = vld [vmem:[#allocation53_spill] sm:$0xff] }
 0x151   : > { %v650_v53 = vmul.f32 %v1095_v59, %v648_v51 }
 0x152   : > { %665 = vperm.xlu1 %1091, %v651_v43   ;;  %v655_v46 = vmul.f32 %v651_v43, %v605_v30  ;;  %v2133_v43 = vld [vmem:[#allocation54_spill] sm:$0xff] }
 0x153   : > { %660 = vperm.xlu0 %1090, %v650_v53   ;;  %v654_v52 = vmul.f32 %v650_v53, %v604_v20 }
 0x154   : > { %v657_v42 = vsub.f32 %v653_v40, %v655_v46  ;;  %v2136_v40 = vld [vmem:[#allocation61_spill] sm:$0xff] }
 0x155   : > { %v656_v35 = vsub.f32 %v652_v10, %v654_v52  ;;  %v2134_v10 = vld [vmem:[#allocation57_spill] sm:$0xff]  ;;  %v2135_v52 = vld [vmem:[#allocation58_spill] sm:$0xff] }
 0x157   : > { %734 = vperm.xlu1 %1091, %v656_v35  }
 0x15b   : > { %739 = vperm.xlu1 %1091, %v657_v42  }
 0x1cd   : > { %v1725_v60 = vpop.permute.xlu1 %665 }
 0x1ce   : > { %v661_v58 = vpop.permute.xlu0 %660  ;;  %v1729_v37 = vmul.f32 %v1725_v60, %v1352_v8  ;;  %v1733_v36 = vmul.f32 %v1725_v60, %v1355_v9  ;;  %v1737_v50 = vmul.f32 %v1725_v60, %v1344_v5  ;;  %v1741_v7 = vmul.f32 %v1725_v60, %v1347_v6  ;;  %v2111_v9 = vld [vmem:[#allocation10_spill] sm:$0xff] }
 0x1cf   : > { %v668_v3 = vmul.f32 %v661_v58, %v1336_v2  ;;  %v669_v48 = vmul.f32 %v661_v58, %v1341_v4  ;;  %v672_v29 = vmul.f32 %v661_v58, %v1330_v0  ;;  %v673_v8 = vmul.f32 %v661_v58, %v1333_v1  ;;  %v2113_v5 = vld [vmem:[#allocation14_spill] sm:$0xff] }
 0x1d0   : > { %v676_v17 = vmul.f32 %v661_v58, %v1368_v14  ;;  %v677_v16 = vmul.f32 %v661_v58, %v2111_v9  ;;  %v680_v57 = vmul.f32 %v661_v58, %v2112_v11  ;;  %v681_v56 = vmul.f32 %v661_v58, %v2113_v5  ;;  %v2115_v6 = vld [vmem:[#allocation18_spill] sm:$0xff] }
 0x1d1   : > { %v684_v45 = vmul.f32 %v661_v58, %v2114_v19  ;;  %v685_v44 = vmul.f32 %v661_v58, %v2115_v6  ;;  %v688_v2 = vmul.f32 %v661_v58, %v2116_v32  ;;  %v689_v4 = vmul.f32 %v661_v58, %v2117_v13  ;;  %v2137_v9 = vld [vmem:[#allocation62_spill] sm:$0xff] }
 0x1d2   : > { %v692_v0 = vmul.f32 %v661_v58, %v2118_v15  ;;  %v693_v1 = vmul.f32 %v661_v58, %v2119_v12  ;;  %v696_v14 = vmul.f32 %v661_v58, %v2120_v38  ;;  %v697_v39 = vmul.f32 %v661_v58, %v2121_v23  ;;  %v735_v62 = vpop.permute.xlu1 %734 }
 0x1d3   : > { %v700_v30 = vmul.f32 %v661_v58, %v2122_v47  ;;  %v701_v20 = vmul.f32 %v661_v58, %v2123_v21  ;;  %v704_v63 = vmul.f32 %v661_v58, %v2124_v41  ;;  %v705_v27 = vmul.f32 %v661_v58, %v2125_v61  ;;  %v2138_v61 = vld [vmem:[#allocation8_spill] sm:$0xff] }
 0x1d4   : > { %v708_v33 = vmul.f32 %v661_v58, %v2126_v25  ;;  %v709_v24 = vmul.f32 %v661_v58, %v2127_v18  ;;  %v712_v49 = vmul.f32 %v661_v58, %v2128_v22  ;;  %v713_v28 = vmul.f32 %v661_v58, %v2129_v54  ;;  %v2139_v25 = vld [vmem:[#allocation9_spill] sm:$0xff]  ;;  %v2140_v18 = vld [vmem:[#allocation11_spill] sm:$0xff]  ;;  %v2141_v22 = vld [vmem:[#allocation12_spill] sm:$0xff] }
 0x1d5   : > { %v716_v26 = vmul.f32 %v661_v58, %v2130_v55  ;;  %v717_v51 = vmul.f32 %v661_v58, %v2131_v34  ;;  %v720_v59 = vmul.f32 %v661_v58, %v2132_v31  ;;  %v721_v53 = vmul.f32 %v661_v58, %v2133_v43  ;;  %v2142_v54 = vld [vmem:[#allocation15_spill] sm:$0xff] }
 0x1d6   : > { %v724_v46 = vmul.f32 %v661_v58, %v2134_v10  ;;  %v725_v35 = vmul.f32 %v661_v58, %v2135_v52  ;;  %v728_v42 = vmul.f32 %v661_v58, %v2136_v40  ;;  %v729_v11 = vmul.f32 %v661_v58, %v2137_v9 }
 0x1d7   : > { %v742_v5 = vadd.f32 %v735_v62, %v668_v3  ;;  %v743_v19 = vadd.f32 %v735_v62, %v669_v48  ;;  %v746_v6 = vadd.f32 %v735_v62, %v672_v29  ;;  %v747_v32 = vadd.f32 %v735_v62, %v673_v8 }
 0x1d8   : > { %v750_v13 = vadd.f32 %v735_v62, %v676_v17  ;;  %v751_v15 = vadd.f32 %v735_v62, %v677_v16  ;;  %v754_v12 = vadd.f32 %v735_v62, %v680_v57  ;;  %v755_v38 = vadd.f32 %v735_v62, %v681_v56 }
 0x1d9   : > { %v758_v23 = vadd.f32 %v735_v62, %v684_v45  ;;  %v759_v47 = vadd.f32 %v735_v62, %v685_v44  ;;  %v762_v21 = vadd.f32 %v735_v62, %v688_v2  ;;  %v763_v41 = vadd.f32 %v735_v62, %v689_v4  ;;  %806 = vst [vmem:[%s1777_s18] sm:$0xff] %v742_v5 }
 0x1da   : > { %807 = vst [vmem:[%s1777_s18 + $0x8] sm:$0xff] %v743_v19  ;;  %810 = vst [vmem:[%s1777_s18 + $0x20] sm:$0xff] %v746_v6  ;;  %v766_v58 = vadd.f32 %v735_v62, %v692_v0  ;;  %v767_v3 = vadd.f32 %v735_v62, %v693_v1  ;;  %v770_v48 = vadd.f32 %v735_v62, %v696_v14  ;;  %v2152_v19 = vld [vmem:[#allocation35_spill] sm:$0xff] }
 0x1db   : > { %811 = vst [vmem:[%s1777_s18 + $0x28] sm:$0xff] %v747_v32  ;;  %v771_v29 = vadd.f32 %v735_v62, %v697_v39  ;;  %814 = vst [vmem:[%s1777_s18 + $0x40] sm:$0xff] %v750_v13  ;;  %v774_v8 = vadd.f32 %v735_v62, %v700_v30  ;;  %v775_v17 = vadd.f32 %v735_v62, %v701_v20  ;;  %v2153_v32 = vld [vmem:[#allocation36_spill] sm:$0xff] }
 0x1dc   : > { %815 = vst [vmem:[%s1777_s18 + $0x48] sm:$0xff] %v751_v15  ;;  %818 = vst [vmem:[%s1777_s18 + $0x60] sm:$0xff] %v754_v12  ;;  %v778_v16 = vadd.f32 %v735_v62, %v704_v63  ;;  %v779_v57 = vadd.f32 %v735_v62, %v705_v27  ;;  %v782_v56 = vadd.f32 %v735_v62, %v708_v33  ;;  %v2154_v15 = vld [vmem:[#allocation39_spill] sm:$0xff] }
 0x1dd   : > { %819 = vst [vmem:[%s1777_s18 + $0x68] sm:$0xff] %v755_v38  ;;  %822 = vst [vmem:[%s1777_s18 + $0x80] sm:$0xff] %v758_v23  ;;  %v783_v45 = vadd.f32 %v735_v62, %v709_v24  ;;  %v786_v44 = vadd.f32 %v735_v62, %v712_v49  ;;  %v787_v2 = vadd.f32 %v735_v62, %v713_v28  ;;  %v2155_v38 = vld [vmem:[#allocation40_spill] sm:$0xff] }
 0x1de   : > { %823 = vst [vmem:[%s1777_s18 + $0x88] sm:$0xff] %v759_v47  ;;  %826 = vst [vmem:[%s1777_s18 + $0xa0] sm:$0xff] %v762_v21  ;;  %v790_v4 = vadd.f32 %v735_v62, %v716_v26  ;;  %v791_v0 = vadd.f32 %v735_v62, %v717_v51  ;;  %v794_v1 = vadd.f32 %v735_v62, %v720_v59  ;;  %v2144_v26 = vld [vmem:[#allocation19_spill] sm:$0xff]  ;;  %v2145_v51 = vld [vmem:[#allocation20_spill] sm:$0xff] }
 0x1df   : > { %827 = vst [vmem:[%s1777_s18 + $0xa8] sm:$0xff] %v763_v41  ;;  %830 = vst [vmem:[%s1777_s18 + $0xc0] sm:$0xff] %v766_v58  ;;  %v795_v14 = vadd.f32 %v735_v62, %v721_v53  ;;  %v798_v39 = vadd.f32 %v735_v62, %v724_v46  ;;  %v799_v30 = vadd.f32 %v735_v62, %v725_v35  ;;  %v2146_v59 = vld [vmem:[#allocation23_spill] sm:$0xff]  ;;  %v2147_v53 = vld [vmem:[#allocation24_spill] sm:$0xff] }
 0x1e0   : > { %831 = vst [vmem:[%s1777_s18 + $0xc8] sm:$0xff] %v767_v3  ;;  %834 = vst [vmem:[%s1777_s18 + $0xe0] sm:$0xff] %v770_v48  ;;  %v802_v20 = vadd.f32 %v735_v62, %v728_v42  ;;  %v803_v63 = vadd.f32 %v735_v62, %v729_v11  ;;  %v678_v27 = vmul.f32 %v1725_v60, %v2138_v61  ;;  %v2143_v62 = vld [vmem:[#allocation16_spill] sm:$0xff]  ;;  %v2148_v46 = vld [vmem:[#allocation27_spill] sm:$0xff]  ;;  %v1851_v3 = vpop.permute.xlu1 %739 }
 0x1e1   : > { %835 = vst [vmem:[%s1777_s18 + $0xe8] sm:$0xff] %v771_v29  ;;  %838 = vst [vmem:[%s1777_s18 + $0x100] sm:$0xff] %v774_v8  ;;  %v679_v33 = vmul.f32 %v1725_v60, %v2139_v25  ;;  %v682_v24 = vmul.f32 %v1725_v60, %v2140_v18  ;;  %v683_v49 = vmul.f32 %v1725_v60, %v2141_v22  ;;  %v2149_v35 = vld [vmem:[#allocation28_spill] sm:$0xff]  ;;  %v2150_v42 = vld [vmem:[#allocation31_spill] sm:$0xff] }
 0x1e2   : > { %839 = vst [vmem:[%s1777_s18 + $0x108] sm:$0xff] %v775_v17  ;;  %842 = vst [vmem:[%s1777_s18 + $0x120] sm:$0xff] %v778_v16  ;;  %v686_v28 = vmul.f32 %v1725_v60, %v2142_v54  ;;  %v687_v55 = vmul.f32 %v1725_v60, %v2143_v62  ;;  %v690_v34 = vmul.f32 %v1725_v60, %v2144_v26  ;;  %v2151_v11 = vld [vmem:[#allocation32_spill] sm:$0xff]  ;;  %v2156_v47 = vld [vmem:[#allocation43_spill] sm:$0xff] }
 0x1e3   : > { %843 = vst [vmem:[%s1777_s18 + $0x128] sm:$0xff] %v779_v57  ;;  %846 = vst [vmem:[%s1777_s18 + $0x140] sm:$0xff] %v782_v56  ;;  %v691_v31 = vmul.f32 %v1725_v60, %v2145_v51  ;;  %v694_v43 = vmul.f32 %v1725_v60, %v2146_v59  ;;  %v695_v10 = vmul.f32 %v1725_v60, %v2147_v53  ;;  %v2157_v41 = vld [vmem:[#allocation44_spill] sm:$0xff]  ;;  %v2158_v48 = vld [vmem:[#allocation47_spill] sm:$0xff] }
 0x1e4   : > { %847 = vst [vmem:[%s1777_s18 + $0x148] sm:$0xff] %v783_v45  ;;  %850 = vst [vmem:[%s1777_s18 + $0x160] sm:$0xff] %v786_v44  ;;  %v698_v52 = vmul.f32 %v1725_v60, %v2148_v46  ;;  %v699_v40 = vmul.f32 %v1725_v60, %v2149_v35  ;;  %v702_v9 = vmul.f32 %v1725_v60, %v2150_v42  ;;  %v2159_v8 = vld [vmem:[#allocation48_spill] sm:$0xff]  ;;  %v2160_v16 = vld [vmem:[#allocation51_spill] sm:$0xff] }
 0x1e5   : > { %851 = vst [vmem:[%s1777_s18 + $0x168] sm:$0xff] %v787_v2  ;;  %854 = vst [vmem:[%s1777_s18 + $0x180] sm:$0xff] %v790_v4  ;;  %v703_v5 = vmul.f32 %v1725_v60, %v2151_v11  ;;  %v706_v6 = vmul.f32 %v1725_v60, %v2152_v19  ;;  %v707_v13 = vmul.f32 %v1725_v60, %v2153_v32  ;;  %v2161_v56 = vld [vmem:[#allocation52_spill] sm:$0xff]  ;;  %v2162_v44 = vld [vmem:[#allocation55_spill] sm:$0xff] }
 0x1e6   : > { %855 = vst [vmem:[%s1777_s18 + $0x188] sm:$0xff] %v791_v0  ;;  %858 = vst [vmem:[%s1777_s18 + $0x1a0] sm:$0xff] %v794_v1  ;;  %v710_v12 = vmul.f32 %v1725_v60, %v2154_v15  ;;  %v711_v23 = vmul.f32 %v1725_v60, %v2155_v38  ;;  %v714_v21 = vmul.f32 %v1725_v60, %v2156_v47  ;;  %v2163_v4 = vld [vmem:[#allocation56_spill] sm:$0xff]  ;;  %v2164_v1 = vld [vmem:[#allocation59_spill] sm:$0xff] }
 0x1e7   : > { %859 = vst [vmem:[%s1777_s18 + $0x1a8] sm:$0xff] %v795_v14  ;;  %862 = vst [vmem:[%s1777_s18 + $0x1c0] sm:$0xff] %v798_v39  ;;  %v715_v58 = vmul.f32 %v1725_v60, %v2157_v41  ;;  %v718_v29 = vmul.f32 %v1725_v60, %v2158_v48  ;;  %v719_v17 = vmul.f32 %v1725_v60, %v2159_v8  ;;  %v2165_v39 = vld [vmem:[#allocation60_spill] sm:$0xff] }
 0x1e8   : > { %863 = vst [vmem:[%s1777_s18 + $0x1c8] sm:$0xff] %v799_v30  ;;  %866 = vst [vmem:[%s1777_s18 + $0x1e0] sm:$0xff] %v802_v20  ;;  %v722_v57 = vmul.f32 %v1725_v60, %v2160_v16  ;;  %v723_v45 = vmul.f32 %v1725_v60, %v2161_v56  ;;  %v726_v2 = vmul.f32 %v1725_v60, %v2162_v44 }
 0x1e9   : > { %867 = vst [vmem:[%s1777_s18 + $0x1e8] sm:$0xff] %v803_v63  ;;  %v727_v0 = vmul.f32 %v1725_v60, %v2163_v4  ;;  %v730_v14 = vmul.f32 %v1725_v60, %v2164_v1  ;;  %v731_v30 = vmul.f32 %v1725_v60, %v2165_v39  ;;  %v744_v20 = vadd.f32 %v1851_v3, %v1729_v37 }
 0x1ea   : > { %v745_v63 = vadd.f32 %v1851_v3, %v1733_v36  ;;  %v748_v61 = vadd.f32 %v1851_v3, %v1737_v50  ;;  %v749_v25 = vadd.f32 %v1851_v3, %v1741_v7  ;;  %v752_v18 = vadd.f32 %v1851_v3, %v678_v27 }
 0x1eb   : > { %v753_v22 = vadd.f32 %v1851_v3, %v679_v33  ;;  %v756_v60 = vadd.f32 %v1851_v3, %v682_v24  ;;  %v757_v37 = vadd.f32 %v1851_v3, %v683_v49  ;;  %v760_v36 = vadd.f32 %v1851_v3, %v686_v28  ;;  %808 = vst [vmem:[%s1777_s18 + $0x10] sm:$0xff] %v744_v20 }
 0x1ec   : > { %v761_v50 = vadd.f32 %v1851_v3, %v687_v55  ;;  %v764_v7 = vadd.f32 %v1851_v3, %v690_v34  ;;  %v765_v27 = vadd.f32 %v1851_v3, %v691_v31  ;;  %809 = vst [vmem:[%s1777_s18 + $0x18] sm:$0xff] %v745_v63  ;;  %812 = vst [vmem:[%s1777_s18 + $0x30] sm:$0xff] %v748_v61 }
 0x1ed   : > { %813 = vst [vmem:[%s1777_s18 + $0x38] sm:$0xff] %v749_v25  ;;  %v768_v33 = vadd.f32 %v1851_v3, %v694_v43  ;;  %v769_v24 = vadd.f32 %v1851_v3, %v695_v10  ;;  %v772_v49 = vadd.f32 %v1851_v3, %v698_v52  ;;  %v773_v54 = vadd.f32 %v1851_v3, %v699_v40 }
 0x1ee   : > { %816 = vst [vmem:[%s1777_s18 + $0x50] sm:$0xff] %v752_v18  ;;  %817 = vst [vmem:[%s1777_s18 + $0x58] sm:$0xff] %v753_v22  ;;  %v776_v28 = vadd.f32 %v1851_v3, %v702_v9  ;;  %v777_v62 = vadd.f32 %v1851_v3, %v703_v5  ;;  %v780_v55 = vadd.f32 %v1851_v3, %v706_v6 }
 0x1ef   : > { %820 = vst [vmem:[%s1777_s18 + $0x70] sm:$0xff] %v756_v60  ;;  %821 = vst [vmem:[%s1777_s18 + $0x78] sm:$0xff] %v757_v37  ;;  %v781_v26 = vadd.f32 %v1851_v3, %v707_v13  ;;  %v784_v34 = vadd.f32 %v1851_v3, %v710_v12  ;;  %v785_v51 = vadd.f32 %v1851_v3, %v711_v23 }
 0x1f0   : > { %824 = vst [vmem:[%s1777_s18 + $0x90] sm:$0xff] %v760_v36  ;;  %825 = vst [vmem:[%s1777_s18 + $0x98] sm:$0xff] %v761_v50  ;;  %v788_v31 = vadd.f32 %v1851_v3, %v714_v21  ;;  %v789_v59 = vadd.f32 %v1851_v3, %v715_v58  ;;  %v792_v43 = vadd.f32 %v1851_v3, %v718_v29 }
 0x1f1   : > { %828 = vst [vmem:[%s1777_s18 + $0xb0] sm:$0xff] %v764_v7  ;;  %829 = vst [vmem:[%s1777_s18 + $0xb8] sm:$0xff] %v765_v27  ;;  %v793_v53 = vadd.f32 %v1851_v3, %v719_v17  ;;  %v796_v10 = vadd.f32 %v1851_v3, %v722_v57  ;;  %v797_v46 = vadd.f32 %v1851_v3, %v723_v45 }
 0x1f2   : > { %832 = vst [vmem:[%s1777_s18 + $0xd0] sm:$0xff] %v768_v33  ;;  %833 = vst [vmem:[%s1777_s18 + $0xd8] sm:$0xff] %v769_v24  ;;  %v800_v52 = vadd.f32 %v1851_v3, %v726_v2  ;;  %v801_v35 = vadd.f32 %v1851_v3, %v727_v0  ;;  %v804_v40 = vadd.f32 %v1851_v3, %v730_v14 }
 0x1f3   : > { %836 = vst [vmem:[%s1777_s18 + $0xf0] sm:$0xff] %v772_v49  ;;  %837 = vst [vmem:[%s1777_s18 + $0xf8] sm:$0xff] %v773_v54  ;;  %v805_v42 = vadd.f32 %v1851_v3, %v731_v30 }
 0x1f4   : > { %840 = vst [vmem:[%s1777_s18 + $0x110] sm:$0xff] %v776_v28  ;;  %841 = vst [vmem:[%s1777_s18 + $0x118] sm:$0xff] %v777_v62 }
 0x1f5   : > { %844 = vst [vmem:[%s1777_s18 + $0x130] sm:$0xff] %v780_v55  ;;  %845 = vst [vmem:[%s1777_s18 + $0x138] sm:$0xff] %v781_v26 }
 0x1f6   : > { %848 = vst [vmem:[%s1777_s18 + $0x150] sm:$0xff] %v784_v34  ;;  %849 = vst [vmem:[%s1777_s18 + $0x158] sm:$0xff] %v785_v51 }
 0x1f7   : > { %852 = vst [vmem:[%s1777_s18 + $0x170] sm:$0xff] %v788_v31  ;;  %853 = vst [vmem:[%s1777_s18 + $0x178] sm:$0xff] %v789_v59 }
 0x1f8   : > { %856 = vst [vmem:[%s1777_s18 + $0x190] sm:$0xff] %v792_v43  ;;  %857 = vst [vmem:[%s1777_s18 + $0x198] sm:$0xff] %v793_v53 }
 0x1f9   : > { %860 = vst [vmem:[%s1777_s18 + $0x1b0] sm:$0xff] %v796_v10  ;;  %861 = vst [vmem:[%s1777_s18 + $0x1b8] sm:$0xff] %v797_v46 }
 0x1fa   : > { %864 = vst [vmem:[%s1777_s18 + $0x1d0] sm:$0xff] %v800_v52  ;;  %865 = vst [vmem:[%s1777_s18 + $0x1d8] sm:$0xff] %v801_v35 }
 0x1fb   : > { %868 = vst [vmem:[%s1777_s18 + $0x1f0] sm:$0xff] %v804_v40  ;;  %869 = vst [vmem:[%s1777_s18 + $0x1f8] sm:$0xff] %v805_v42 }
 0x1fc   : > { %1137 = shalt.err (!%p1134_p6)
}
 0x1fd   : > { %s1138_s6 = scalar_lea.hbm %s1926_s23, 8192  ;;  %s1142_s9 = scalar_lea.hbm %s1995_s3, 16384 }
 0x1fe   : > { %p1139_p7 = scmp.ne.s32.totalorder %s1926_s23, %s1138_s6  ;;  %p1143_p13 = scmp.lt.s32.totalorder %s1926_s23, %s1995_s3 }
 0x1ff   : > { %p1144_p2 = scmp.lt.s32.totalorder %s1142_s9, %s1138_s6 }
 0x200   : > { %p1140_p10 = pnand %p1139_p7, %p1284_p9 }
 0x201   : > { %p1145_p8 = por %p1144_p2, %p1143_p13 }
 0x202   : > { %p1141_p4 = pneg %p1140_p10 }
 0x204   : > { %p1146_p12 = pnand %p1145_p8, %p1141_p4 }
 0x206   : > { %1149 = shalt.err (!%p1146_p12)
}
 0x207   : > { %s1211_s18 = smov 256   ;;  %s1212_s19 = smov 16  }
 0x208   : > { %1025 = dma.vmem_to_hbm [thread:$0]  (%p1284_p9), %s1928_s21, 8192, %s1926_s23, %s871_s29, %s1211_s18, %s1211_s18, %s1212_s19  }
 0x209 PF: > { %s902_s15 = sand.u32 1, %s1184_s12   ;;  %p2166_p0 = scmp.ge.s32.totalorder %s1204_s17, 2 }
 0x20a   : > { %s903_s22 = scalar_lea.sflag [#allocation4], %s902_s15 }
 0x20b   : > { %p1032_p1 = pnand %p2166_p0, %p1291_p11 }
 0x20d   : > { %p1033_p3 = pneg %p1032_p1 }
 0x20f   : > { %1179 = dma.done.wait (%p1033_p3), %s903_s22, 8192  }
 0x210   : > { %1181 = vsyncadd (%p1033_p3), %s903_s22, 4294959104  ;;  %s19_s17 = sadd.s32 1, %s1204_s17   ;;  %s2167_s12 = smov %s1188_s13 }
 0x211   : > { %p16_p5 = scmp.ge.s32.totalorder %s19_s17, 4   ;;  %s2168_s13 = smov %s1192_s14 }
 0x212   : > { %s2169_s14 = smov %s1289_s26  ;;  %s2170_s15 = smov %s1200_s16 }
 0x213   : > { %s2171_s16 = smov %s2173_s20  ;;  %18 = sbr.rel (!%p16_p5) target bundleno = 6 (0x6), region = 83 }
 0x218   :  { %908 = vsyncpa [#allocation3], 1 }
 0x219   :  { %910 = vsyncpa [#allocation3 + $0x1], 1 }
 0x21a   :  { %911 = vsyncpa [#allocation4], 1 }
 0x21b   :  { %913 = vsyncpa [#allocation4 + $0x1], 1 }

</bundles_post_ra>
